<compile_context>
chip_gen: v5e
topology: v5e:2x2
jax: 0.10.0
libtpu: 0.0.40
codegen_flags: <defaults>
</compile_context>

<pallas_src>
import functools

import jax
import jax.numpy as jnp
from jax import lax
from jax.experimental import pallas as pl
from jax.experimental.pallas import tpu as pltpu


# ---------------------------------------------------------------------------
# Pallas kernels
# ---------------------------------------------------------------------------

def _stats_kernel(x_ref, m_ref, o_ref, *, rows, count, needs_mask):
    """Accumulate per-(batch, group) sum / sum-of-squares over row tiles.

    x_ref : (1, rt, L)  activation tile (rows x lanes)
    m_ref : (L, G)      one-hot lane -> group matrix
    o_ref : (1, 2, G)   accumulator; finalized in-place to (mean, var)
    """
    t = pl.program_id(1)

    @pl.when(t == 0)
    def _():
        o_ref[...] = jnp.zeros_like(o_ref)

    x = x_ref[0].astype(jnp.float32)                          # (rt, L)
    if needs_mask:                                            # ragged last tile
        rid = lax.broadcasted_iota(jnp.int32, x.shape, 0)
        x = jnp.where(t * x.shape[0] + rid < rows, x, 0.0)

    g = m_ref.shape[1]
    s1 = jnp.sum(x, axis=0, keepdims=True)                    # (1, L)
    s2 = jnp.sum(x * x, axis=0, keepdims=True)                # (1, L)
    if g == 1:
        ps = jnp.sum(s1, axis=1, keepdims=True)               # (1, 1)
        pss = jnp.sum(s2, axis=1, keepdims=True)              # (1, 1)
    else:
        m = m_ref[...]
        ps = jnp.dot(s1, m, preferred_element_type=jnp.float32)    # (1, G)
        pss = jnp.dot(s2, m, preferred_element_type=jnp.float32)   # (1, G)
    o_ref[0] += jnp.concatenate([ps, pss], axis=0)            # (2, G)

    @pl.when(t == pl.num_programs(1) - 1)
    def _():
        inv_n = 1.0 / count
        acc = o_ref[0]
        mean = acc[0:1, :] * inv_n
        var = acc[1:2, :] * inv_n - mean * mean               # biased, like torch
        o_ref[0] = jnp.concatenate([mean, var], axis=0)


def _apply_kernel(x_ref, s_ref, m_ref, g_ref, b_ref, o_ref, *, eps):
    """Elementwise normalize (+ optional affine) for one row tile."""
    x = x_ref[0].astype(jnp.float32)                          # (rt, L)
    st = s_ref[0]                                             # (2, G)
    mean, var = st[0:1, :], st[1:2, :]                        # (1, G)
    scale_g = g_ref[...] * lax.rsqrt(var + eps)               # (1, G)
    shift_g = b_ref[...] - mean * scale_g                     # (1, G)

    g = m_ref.shape[1]
    if g == 1:
        y = x * scale_g + shift_g                             # scalar broadcast
    else:
        dn = (((1,), (1,)), ((), ()))                         # (1,G)x(L,G)->(1,L)
        scale = lax.dot_general(scale_g, m_ref[...], dn,
                                preferred_element_type=jnp.float32)
        shift = lax.dot_general(shift_g, m_ref[...], dn,
                                preferred_element_type=jnp.float32)
        y = x * scale + shift
    o_ref[0] = y.astype(o_ref.dtype)


# ---------------------------------------------------------------------------
# wrapper
# ---------------------------------------------------------------------------

def _choose_row_tile(rows, lanes, target_bytes=2 << 20):
    """Largest multiple-of-8 row tile whose f32 block stays ~<= target_bytes."""
    t = max(8, (target_bytes // (lanes * 4)) // 8 * 8)
    t = min(t, 1024)
    return rows if t >= rows else t


def instance_norm_forward(data, num_features=1, eps=1e-5,
                          weight=None, bias=None, row_tile=None):
    """Pallas forward of nussl InstanceNorm (feature_dim=2).

    data : (nb, nt, nf, nc); weight/bias optional, shape (num_features,).
    """
    nb, nt, nf, nc = data.shape
    g = int(num_features)
    if nf % g != 0:
        # TODO(synk): groups straddling the feature axis (nf % num_features != 0)
        # are not supported by the lane-contiguous grouping used here.
        raise ValueError("num_features must divide nf")

    feats = nf * nc
    x = data.reshape(nb, nt, feats)
    rows, lanes = nt, feats
    # Lane-dense fast path for the common num_features == 1 case: re-view the
    # sample as (rows, 128) so stores are full-lane even when nf*nc < 128.
    if g == 1 and (nt * feats) % 128 == 0:
        rows, lanes = (nt * feats) // 128, 128
        x = x.reshape(nb, rows, lanes)

    if row_tile is None:
        rt = _choose_row_tile(rows, lanes)
    else:
        rt = max(8, (row_tile // 8) * 8)
        if rt >= rows:
            rt = rows
    grid_t = pl.cdiv(rows, rt)
    needs_mask = (rows % rt) != 0
    group_w = lanes // g
    count = float(rows * lanes // g)

    onehot = (jnp.arange(lanes)[:, None] // group_w
              == jnp.arange(g)[None, :]).astype(jnp.float32)          # (L, G)
    gamma = (jnp.ones((1, g), jnp.float32) if weight is None
             else weight.reshape(1, g).astype(jnp.float32))
    beta = (jnp.zeros((1, g), jnp.float32) if bias is None
            else bias.reshape(1, g).astype(jnp.float32))

    # pass 1: per-(batch, group) mean / var
    stats = pl.pallas_call(
        functools.partial(_stats_kernel, rows=rows, count=count,
                          needs_mask=needs_mask),
        out_shape=jax.ShapeDtypeStruct((nb, 2, g), jnp.float32),
        grid=(nb, grid_t),
        in_specs=[
            pl.BlockSpec((1, rt, lanes), lambda b, t: (b, t, 0)),
            pl.BlockSpec((lanes, g), lambda b, t: (0, 0)),
        ],
        out_specs=pl.BlockSpec((1, 2, g), lambda b, t: (b, 0, 0)),
        compiler_params=pltpu.CompilerParams(
            dimension_semantics=("parallel", "arbitrary")),
    )(x, onehot)

    # pass 2: normalize + affine
    out = pl.pallas_call(
        functools.partial(_apply_kernel, eps=eps),
        out_shape=jax.ShapeDtypeStruct((nb, rows, lanes), data.dtype),
        grid=(nb, grid_t),
        in_specs=[
            pl.BlockSpec((1, rt, lanes), lambda b, t: (b, t, 0)),
            pl.BlockSpec((1, 2, g), lambda b, t: (b, 0, 0)),
            pl.BlockSpec((lanes, g), lambda b, t: (0, 0)),
            pl.BlockSpec((1, g), lambda b, t: (0, 0)),
            pl.BlockSpec((1, g), lambda b, t: (0, 0)),
        ],
        out_specs=pl.BlockSpec((1, rt, lanes), lambda b, t: (b, t, 0)),
        compiler_params=pltpu.CompilerParams(
            dimension_semantics=("parallel", "parallel")),
    )(x, stats, onehot, gamma, beta)

    return out.reshape(nb, nt, nf, nc)


# ---------------------------------------------------------------------------
# pure-JAX reference mirroring the PyTorch module exactly
# ---------------------------------------------------------------------------

def ref_forward(data, num_features=1, eps=1e-5, weight=None, bias=None):
    nb, nt, nf, nc = data.shape
    x = jnp.transpose(data, (0, 2, 1, 3)).reshape(nb, num_features, -1)
    m = x.mean(axis=2, keepdims=True)
    v = ((x - m) ** 2).mean(axis=2, keepdims=True)
    y = (x - m) / jnp.sqrt(v + eps)
    if weight is not None:
        y = y * weight[None, :, None] + bias[None, :, None]
    y = y.reshape(nb, nf, nt, nc)
    return jnp.transpose(y, (0, 2, 1, 3))


# ---------------------------------------------------------------------------

if __name__ == "__main__":
    key = jax.random.PRNGKey(0)
    k1, k2, k3, k4 = jax.random.split(key, 4)

    # Config 1: module defaults (num_features=1, no affine).  nt*nf*nc is a
    # multiple of 128 -> exercises the lane-dense repack; row_tile=8 forces
    # multi-tile accumulation in the stats pass.
    data1 = 3.0 * jax.random.normal(k1, (2, 64, 32, 1), jnp.float32) + 1.5
    out1 = jax.block_until_ready(instance_norm_forward(data1, row_tile=8))
    ref1 = ref_forward(data1)
    assert out1.shape == data1.shape, out1.shape
    err1 = float(jnp.max(jnp.abs(out1 - ref1)))
    assert jnp.allclose(out1, ref1, atol=1e-4, rtol=1e-4), err1

    # Config 2: per-feature stats (num_features == nf), affine on, nc > 1,
    # ragged row count -> exercises the masked last tile and the grouped path.
    nb, nt, nf, nc = 2, 20, 16, 2
    data2 = 2.0 * jax.random.normal(k2, (nb, nt, nf, nc), jnp.float32) - 0.7
    w = 1.0 + 0.1 * jax.random.normal(k3, (nf,), jnp.float32)
    b = 0.05 * jax.random.normal(k4, (nf,), jnp.float32)
    out2 = jax.block_until_ready(
        instance_norm_forward(data2, num_features=nf, weight=w, bias=b,
                              row_tile=8))
    ref2 = ref_forward(data2, num_features=nf, weight=w, bias=b)
    err2 = float(jnp.max(jnp.abs(out2 - ref2)))
    assert jnp.allclose(out2, ref2, atol=1e-4, rtol=1e-4), err2

    print("KERNEL_OK")
</pallas_src>

<mosaic_0001>
module attributes {stable_mosaic.version = 11 : i64} {
  func.func @_stats_kernel(%arg0: i32, %arg1: i32, %arg2: memref<1x8x128xf32, #tpu.memory_space<vmem>>, %arg3: memref<128x1xf32, #tpu.memory_space<vmem>>, %arg4: memref<1x2x1xf32, #tpu.memory_space<vmem>>) attributes {dimension_semantics = [#tpu.dimension_semantics<parallel>, #tpu.dimension_semantics<arbitrary>], iteration_bounds = array<i64: 2, 2>, scalar_prefetch = 0 : i64, scratch_operands = 0 : i64, tpu.core_type = #tpu.core_type<tc>, window_params = [{transform_indices = @transform_0, window_bounds = array<i64: 1, 8, 128>}, {pipeline_mode = #tpu.pipeline_mode<synchronous>, transform_indices = @transform_1, window_bounds = array<i64: 128, 1>}, {transform_indices = @transform_2, window_bounds = array<i64: 1, 2, 1>}]} {
    %c0_i32 = arith.constant 0 : i32
    %0 = arith.cmpi eq, %arg1, %c0_i32 : i32
    %1 = arith.extui %0 : i1 to i32
    %c0_i32_0 = arith.constant 0 : i32
    %2 = arith.cmpi ne, %1, %c0_i32_0 : i32
    scf.if %2 {
      %cst_13 = arith.constant 0.000000e+00 : f32
      %24 = vector.broadcast %cst_13 : f32 to vector<1x2x1xf32>
      %c0_14 = arith.constant 0 : index
      %c0_15 = arith.constant 0 : index
      %c0_16 = arith.constant 0 : index
      %25 = vector.load %arg4[%c0_14, %c0_15, %c0_16] : memref<1x2x1xf32, #tpu.memory_space<vmem>>, vector<1x2x1xf32>
      tpu.vector_store %arg4[%c0_14, %c0_15, %c0_16], %24 {strides = array<i32>} : memref<1x2x1xf32, #tpu.memory_space<vmem>>, vector<1x2x1xf32>,
    } else {
    }
    %c0 = arith.constant 0 : index
    %c0_1 = arith.constant 0 : index
    %c0_2 = arith.constant 0 : index
    %3 = vector.load %arg2[%c0, %c0_1, %c0_2] : memref<1x8x128xf32, #tpu.memory_space<vmem>>, vector<1x8x128xf32>
    %4 = vector.shape_cast %3 : vector<1x8x128xf32> to vector<8x128xf32>
    %cst = arith.constant dense<0.000000e+00> : vector<128xf32>
    %5 = vector.multi_reduction <add>, %4, %cst [0] : vector<8x128xf32> to vector<128xf32>
    %6 = vector.shape_cast %5 : vector<128xf32> to vector<1x128xf32>
    %7 = arith.mulf %4, %4 : vector<8x128xf32>
    %cst_3 = arith.constant dense<0.000000e+00> : vector<128xf32>
    %8 = vector.multi_reduction <add>, %7, %cst_3 [0] : vector<8x128xf32> to vector<128xf32>
    %9 = vector.shape_cast %8 : vector<128xf32> to vector<1x128xf32>
    %cst_4 = arith.constant dense<0.000000e+00> : vector<1xf32>
    %10 = vector.multi_reduction <add>, %6, %cst_4 [1] : vector<1x128xf32> to vector<1xf32>
    %11 = vector.shape_cast %10 : vector<1xf32> to vector<1x1xf32>
    %cst_5 = arith.constant dense<0.000000e+00> : vector<1xf32>
    %12 = vector.multi_reduction <add>, %9, %cst_5 [1] : vector<1x128xf32> to vector<1xf32>
    %13 = vector.shape_cast %12 : vector<1xf32> to vector<1x1xf32>
    %c0_6 = arith.constant 0 : index
    %c0_7 = arith.constant 0 : index
    %c0_8 = arith.constant 0 : index
    %14 = vector.load %arg4[%c0_6, %c0_7, %c0_8] : memref<1x2x1xf32, #tpu.memory_space<vmem>>, vector<1x2x1xf32>
    %15 = vector.shape_cast %14 : vector<1x2x1xf32> to vector<2x1xf32>
    %16 = tpu.concatenate %11, %13 in 0 : vector<1x1xf32>, vector<1x1xf32> -> vector<2x1xf32>
    %17 = arith.addf %15, %16 : vector<2x1xf32>
    %c0_9 = arith.constant 0 : index
    %c0_10 = arith.constant 0 : index
    %c0_11 = arith.constant 0 : index
    %18 = vector.load %arg4[%c0_9, %c0_10, %c0_11] : memref<1x2x1xf32, #tpu.memory_space<vmem>>, vector<1x2x1xf32>
    %19 = vector.shape_cast %18 : vector<1x2x1xf32> to vector<2x1xf32>
    %20 = vector.shape_cast %17 : vector<2x1xf32> to vector<1x2x1xf32>
    tpu.vector_store %arg4[%c0_9, %c0_10, %c0_11], %20 {strides = array<i32>} : memref<1x2x1xf32, #tpu.memory_space<vmem>>, vector<1x2x1xf32>,
    %c1_i32 = arith.constant 1 : i32
    %21 = arith.cmpi eq, %arg1, %c1_i32 : i32
    %22 = arith.extui %21 : i1 to i32
    %c0_i32_12 = arith.constant 0 : i32
    %23 = arith.cmpi ne, %22, %c0_i32_12 : i32
    scf.if %23 {
      %c0_13 = arith.constant 0 : index
      %c0_14 = arith.constant 0 : index
      %c0_15 = arith.constant 0 : index
      %24 = vector.load %arg4[%c0_13, %c0_14, %c0_15] : memref<1x2x1xf32, #tpu.memory_space<vmem>>, vector<1x2x1xf32>
      %25 = vector.shape_cast %24 : vector<1x2x1xf32> to vector<2x1xf32>
      %26 = vector.extract_strided_slice %25 {offsets = [0, 0], sizes = [1, 1], strides = [1, 1]} : vector<2x1xf32> to vector<1x1xf32>
      %cst_16 = arith.constant 4.8828125E-4 : f32
      %27 = vector.broadcast %cst_16 : f32 to vector<1x1xf32>
      %28 = arith.mulf %26, %27 : vector<1x1xf32>
      %29 = vector.extract_strided_slice %25 {offsets = [1, 0], sizes = [1, 1], strides = [1, 1]} : vector<2x1xf32> to vector<1x1xf32>
      %cst_17 = arith.constant 4.8828125E-4 : f32
      %30 = vector.broadcast %cst_17 : f32 to vector<1x1xf32>
      %31 = arith.mulf %29, %30 : vector<1x1xf32>
      %32 = arith.mulf %28, %28 : vector<1x1xf32>
      %33 = arith.subf %31, %32 : vector<1x1xf32>
      %34 = tpu.concatenate %28, %33 in 0 : vector<1x1xf32>, vector<1x1xf32> -> vector<2x1xf32>
      %c0_18 = arith.constant 0 : index
      %c0_19 = arith.constant 0 : index
      %c0_20 = arith.constant 0 : index
      %35 = vector.load %arg4[%c0_18, %c0_19, %c0_20] : memref<1x2x1xf32, #tpu.memory_space<vmem>>, vector<1x2x1xf32>
      %36 = vector.shape_cast %35 : vector<1x2x1xf32> to vector<2x1xf32>
      %37 = vector.shape_cast %34 : vector<2x1xf32> to vector<1x2x1xf32>
      tpu.vector_store %arg4[%c0_18, %c0_19, %c0_20], %37 {strides = array<i32>} : memref<1x2x1xf32, #tpu.memory_space<vmem>>, vector<1x2x1xf32>,
    } else {
    }
    return
  }
  func.func @transform_0(%arg0: i32, %arg1: i32) -> (i32, i32, i32) {
    %c0_i32 = arith.constant 0 : i32
    %c0_i32_0 = arith.constant 0 : i32
    return %arg0, %arg1, %c0_i32 : i32, i32, i32
  }
  func.func @transform_1(%arg0: i32, %arg1: i32) -> (i32, i32) {
    %c0_i32 = arith.constant 0 : i32
    %c0_i32_0 = arith.constant 0 : i32
    %c0_i32_1 = arith.constant 0 : i32
    return %c0_i32, %c0_i32_0 : i32, i32
  }
  func.func @transform_2(%arg0: i32, %arg1: i32) -> (i32, i32, i32) {
    %c0_i32 = arith.constant 0 : i32
    %c0_i32_0 = arith.constant 0 : i32
    %c0_i32_1 = arith.constant 0 : i32
    return %arg0, %c0_i32, %c0_i32_0 : i32, i32, i32
  }
}

</mosaic_0001>

<bundles_post_ra>
// kernel: tpu_custom_call.1
= control target key start
LH: loop header
LB: loop body
LE: loop exit
PB: predicated region body
PF: predicated region fallthrough
CT: control target
= control target key end

     0   :  { %s387_s9 = smov 0   ;;  %s389_s10 = smov 0   ;;  %s451_s0 = inlined_call_operand.vmem [shape: f32[2,16,128], index: 0, kind: input, shape index: {}]   ;;  %s452_s1 = inlined_call_operand.vmem [shape: f32[128,1], index: 1, kind: input, shape index: {}]   ;;  %s453_s2 = inlined_call_operand.vmem [shape: f32[2,2,1], index: 2, kind: output, shape index: {}]  }
   0x1   :  { %s391_s11 = smov 0   ;;  %s393_s12 = smov 0  }
   0x2   :  { %s395_s13 = smov 0  }
   0x3 LB: > { %s21_s1 = sadd.s32 1, %s361_s11  ;;  %s24_s14 = sadd.s32 1, %s365_s12  ;;  %s369_s13 = sphi %s395_s13, %s12_s13   ;;  %s365_s12 = sphi %s393_s12, %s457_s12   ;;  %s361_s11 = sphi %s391_s11, %s456_s11   ;;  %s357_s10 = sphi %s389_s10, %s455_s10   ;;  %s353_s9 = sphi %s387_s9, %s454_s9  }
   0x4   : > { %p22_p0 = scmp.ge.s32.totalorder %s21_s1, 2  ;;  %p282_p1 = scmp.ge.s32.totalorder %s369_s13, 1 }
   0x5   : > { %p129_p2 = scmp.lt.s32.totalorder %s369_s13, 5 }
   0x6   : > { %s459_s1 = smov (%p22_p0, %s21_s1), 0  ;;  %s461_s14 = smov (!%p22_p0, %s24_s14), %s365_s12 }
   0x7   : > { %p130_p3 = pnand %p282_p1, %p129_p2  ;;  %p26_p4 = scmp.ge.s32.totalorder %s461_s14, 2 }
   0x8   : > { %p153_p5 = scmp.lt.s32.totalorder (!%p130_p3), %s357_s10, 1  ;;  %p155_p6 = scmp.lt.s32.totalorder (!%p130_p3), %s353_s9, 1 }
   0x9   : > { %s463_s14 = smov (%p26_p4, %s461_s14), 0  ;;  %133 = sbr.rel (%p130_p3) target bundleno = 181 (0xb5), region = 28 }
   0xa   : > { %p286_p7 = scmp.ne.s32.totalorder (!%p130_p3), %s353_s9, 0 }
   0xe   : > { %s465_s10 = smov (!%p153_p5, %s357_s10), 1 }
   0xf   : > { %s156_s15 = scalar_select %p155_p6, %s353_s9, 1 }
  0x10   : > { %s283_s16 = sshll.u32 %s465_s10, 1  ;;  %168 = sbr.rel (%p286_p7) target bundleno = 23 (0x17), region = 32 }
  0x11   : > { %s158_s17 = sadd.s32 %s283_s16, %s156_s15  ;;  %s424_s20 = scalar_lea.vmem %s453_s2, %s283_s16 }
  0x12   : > { %s284_s21 = sshll.u32 %s158_s17, 3 }
  0x13   : > { %s160_s24 = scalar_lea.vmem %s451_s0, %s284_s21 }
  0x15   : > { %vm169_vm0 = vcmask 1024   ;;  %v371_v0 = vmov 0.0  }
  0x16   : > { %170 = vst.msk [vmem:[%s424_s20] sm:$0x3] %vm169_vm0, %v371_v0 }
  0x17 PF: > { %v171_v1 = vld [vmem:[%s160_s24] sm:$0xff]  ;;  %vm190_vm1 = vcmask 1040384   ;;  %vm193_vm2 = vcmask 1024   ;;  %p287_p8 = scmp.ne.s32.totalorder %s353_s9, 1 }
  0x18   : > { %v172_v2 = vrot.slane %v171_v1, 4  ;;  %v178_v3 = vmul.f32 %v171_v1, %v171_v1 }
  0x1a   : > { %v173_v4 = vadd.f32 %v172_v2, %v171_v1  ;;  %v179_v5 = vrot.slane %v178_v3, 4 }
  0x1c   : > { %v174_v6 = vrot.slane %v173_v4, 2  ;;  %v180_v7 = vadd.f32 %v179_v5, %v178_v3 }
  0x1d   : > { %v189_v16 = vld [vmem:[%s424_s20] sm:$0x3] }
  0x1e   : > { %v175_v8 = vadd.f32 %v174_v6, %v173_v4  ;;  %v181_v9 = vrot.slane %v180_v7, 2 }
  0x20   : > { %v176_v10 = vrot.slane %v175_v8, 1  ;;  %v182_v11 = vadd.f32 %v181_v9, %v180_v7 }
  0x22   : > { %v177_v12 = vadd.f32 %v176_v10, %v175_v8  ;;  %v183_v13 = vrot.slane %v182_v11, 1 }
  0x24   : > { %185 = vadd.xlane.f32.xlu0 %v177_v12  ;;  %v184_v14 = vadd.f32 %v183_v13, %v182_v11 }
  0x2c   : > { %187 = vadd.xlane.f32.xlu0 %v184_v14 }
  0x97   : > { %v186_v15 = vpop.xlane.xlu0 %185 }
  0x9f   : > { %v188_v17 = vpop.xlane.xlu0 %187  ;;  %198 = sbr.rel (%p287_p8) target bundleno = 181 (0xb5), region = 36 }
  0xa0   : > { %v191_v18 = vsel %vm190_vm1, %v186_v15, %v188_v17 }
  0xa1   : > { %v192_v19 = vadd.f32 %v191_v18, %v189_v16 }
  0xa3   : > { %194 = vst.msk [vmem:[%s424_s20] sm:$0x3] %vm193_vm2, %v192_v19 }
  0xaa   : > { %v199_v20 = vld [vmem:[%s424_s20] sm:$0x3] }
  0xab   : > { %v200_v21 = vmul.f32 0.00048828125, %v199_v20 }
  0xad   : > { %v201_v22 = vmul.f32 %v200_v21, %v200_v21 }
  0xaf   : > { %v203_v23 = vrot.slane %v201_v22, 7 }
  0xb1   : > { %v205_v24 = vsub.f32 %v200_v21, %v203_v23 }
  0xb3   : > { %v206_v25 = vsel %vm190_vm1, %v200_v21, %v205_v24 }
  0xb4   : > { %207 = vst.msk [vmem:[%s424_s20] sm:$0x3] %vm193_vm2, %v206_v25 }
  0xb5 PF: > { %s12_s13 = sadd.s32 1, %s369_s13   ;;  %s454_s9 = smov %s361_s11 }
  0xb6   : > { %p9_p9 = scmp.ge.s32.totalorder %s12_s13, 6   ;;  %s455_s10 = smov %s365_s12 }
  0xb7   : > { %s456_s11 = smov %s459_s1  ;;  %s457_s12 = smov %s463_s14 }
  0xb8   :  { %11 = sbr.rel (!%p9_p9) target bundleno = 3 (0x3), region = 66 }

</bundles_post_ra>
